<compile_context>
chip_gen: v7x
topology: tpu7x:2x2x1
jax: 0.10.0
libtpu: 0.0.40
codegen_flags: <defaults>
</compile_context>

<pallas_src>
import jax
import jax.numpy as jnp
import numpy as np
from jax.experimental import pallas as pl
from jax.experimental.pallas import tpu as pltpu


def _round_up(n, m):
    return ((n + m - 1) // m) * m


# --------------------------------------------------------------------------- #
# Pallas kernel: one (batch-tile, output-channel) pair per grid step.
# --------------------------------------------------------------------------- #
def _spectral_conv2d_kernel(x_ref, fm_ref, g_ref, o_ref):
    # x_ref : (TB, Cin*H*W)  bf16   batch tile, channels+space flattened
    # fm_ref: (Cin*H*W, 2K)  bf16   truncated DFT + complex mode mix, THIS o
    # g_ref : (2K, H*W)      bf16   shared truncated inverse transform
    # o_ref : (TB, H*W)      f32    output tile for THIS output channel
    mixed = jnp.dot(x_ref[...], fm_ref[...],
                    preferred_element_type=jnp.float32)           # (TB, 2K) f32
    y = jnp.dot(mixed.astype(jnp.bfloat16), g_ref[...],
                preferred_element_type=jnp.float32)               # (TB, H*W) f32
    o_ref[...] = y.astype(o_ref.dtype)


def spectral_conv2d_pallas(x, fm3, g):
    """x: (B, Cin, H, W) f32; fm3: (Cout, Cin*H*W, 2K) bf16; g: (2K, H*W) bf16.
    Returns (B, Cout, H, W) f32."""
    b, cin, h, w = x.shape
    hw = h * w
    cin_flat = cin * hw
    cout, cin_flat_op, two_k = fm3.shape
    assert cin_flat_op == cin_flat and g.shape == (two_k, hw)

    # Batch tile: up to 256 MXU rows per step, padded to a sublane multiple.
    tb = min(256, _round_up(b, 8))
    b_pad = _round_up(b, tb)
    x2 = x.reshape(b, cin_flat).astype(jnp.bfloat16)
    if b_pad != b:
        x2 = jnp.pad(x2, ((0, b_pad - b), (0, 0)))

    n_tiles = b_pad // tb
    grid = (n_tiles, cout)

    flops = 2 * b_pad * cout * (cin_flat * two_k + two_k * hw)
    bytes_accessed = (b_pad * cin_flat * 2            # x tiles (reused across o)
                      + n_tiles * int(fm3.size) * 2   # FM streamed per batch tile
                      + int(g.size) * 2
                      + b_pad * cout * hw * 4)        # f32 output

    out = pl.pallas_call(
        _spectral_conv2d_kernel,
        out_shape=jax.ShapeDtypeStruct((b_pad, cout * hw), jnp.float32),
        grid=grid,
        in_specs=[
            # x tile: block index constant across the inner Cout axis
            # -> DMA'd once per batch tile, re-used for every output channel.
            pl.BlockSpec((tb, cin_flat), lambda i, o: (i, 0)),
            # per-output-channel fused DFT + mode-mix operator, streamed over o
            pl.BlockSpec((None, cin_flat, two_k), lambda i, o: (o, 0, 0)),
            # shared inverse transform (tiny, grid-invariant)
            pl.BlockSpec((two_k, hw), lambda i, o: (0, 0)),
        ],
        out_specs=pl.BlockSpec((tb, hw), lambda i, o: (i, o)),
        compiler_params=pltpu.CompilerParams(
            dimension_semantics=("parallel", "parallel"),
        ),
        cost_estimate=pl.CostEstimate(
            flops=int(flops), transcendentals=0,
            bytes_accessed=int(bytes_accessed)),
    )(x2, fm3, g)

    return out[:b].reshape(b, cout, h, w)


# --------------------------------------------------------------------------- #
# Host-side precompute of the fused operators (numpy, float64 -> bf16).
# --------------------------------------------------------------------------- #
def build_spectral_operators(weights1, weights2, height, width):
    """weights1/weights2: complex (Cin, Cout, modes1, modes2) parameters of
    SpectralConv2d_fast (weights1 -> kx rows [0:m1], weights2 -> rows [-m1:]).

    Returns:
      fm3 (Cout, Cin*H*W, 2K) bf16 : forward truncated DFT folded with the
                                     complex per-mode mix, per output channel.
      g   (2K, H*W)          bf16 : shared truncated inverse transform.
    """
    w1 = np.asarray(weights1)
    w2 = np.asarray(weights2)
    cin, cout, m1, m2 = w1.shape
    h, w = height, width
    assert 2 * m1 <= h, "modes1 blocks must not overlap (need 2*modes1 <= H)"
    assert m2 <= w // 2 + 1, "modes2 must fit inside the rfft axis"

    kh = 2 * m1                      # kept H-frequencies: [0..m1-1] + [H-m1..H-1]
    K = kh * m2                      # kept modes per channel
    kx = np.concatenate([np.arange(m1), np.arange(h - m1, h)])
    ky = np.arange(m2)

    ph_h = 2.0 * np.pi * np.outer(np.arange(h), kx) / h            # (H, Kh)
    ph_w = 2.0 * np.pi * np.outer(np.arange(w), ky) / w            # (W, m2)
    theta = ph_h[:, None, :, None] + ph_w[None, :, None, :]        # (H, W, Kh, m2)
    cos_f = np.cos(theta).reshape(h * w, K)                        # (H*W, K)
    sin_f = np.sin(theta).reshape(h * w, K)

    # learned complex mix, mode-flattened to match the kx ordering above
    wr = np.concatenate([w1.real, w2.real], axis=2).reshape(cin, cout, K).astype(np.float64)
    wi = np.concatenate([w1.imag, w2.imag], axis=2).reshape(cin, cout, K).astype(np.float64)

    # FM[o, i*HW + p, k]     ->  Re(A[o,k]) coefficient:  cos*wr + sin*wi
    # FM[o, i*HW + p, K + k] ->  Im(A[o,k]) coefficient:  cos*wi - sin*wr
    fm_re = (np.einsum('pk,iok->oipk', cos_f, wr)
             + np.einsum('pk,iok->oipk', sin_f, wi))
    fm_im = (np.einsum('pk,iok->oipk', cos_f, wi)
             - np.einsum('pk,iok->oipk', sin_f, wr))
    fm3 = np.concatenate([fm_re, fm_im], axis=-1).reshape(cout, cin * h * w, 2 * K)

    # inverse: y = Re(A)*g_cos + Im(A)*g_sin  (irfft2 over the kept modes only)
    coef = np.full((m2,), 2.0)                  # rfft conjugate-symmetry factor
    coef[0] = 1.0                               # DC counted once
    if w % 2 == 0 and m2 == w // 2 + 1:
        coef[-1] = 1.0                          # Nyquist counted once
    coef_k = np.broadcast_to(coef[None, :], (kh, m2)).reshape(K)
    g_cos = (coef_k[:, None] * cos_f.T) / (h * w)                  # (K, H*W)
    g_sin = (-coef_k[:, None] * sin_f.T) / (h * w)
    g = np.concatenate([g_cos, g_sin], axis=0)                     # (2K, H*W)

    return (jnp.asarray(fm3, dtype=jnp.bfloat16),
            jnp.asarray(g, dtype=jnp.bfloat16))


# --------------------------------------------------------------------------- #
# Pure-JAX reference (mirrors the PyTorch forward exactly).
# --------------------------------------------------------------------------- #
def spectral_conv2d_reference(x, weights1, weights2, modes1, modes2):
    b, cin, h, w = x.shape
    cout = weights1.shape[1]
    x_ft = jnp.fft.rfft2(x)
    out_ft = jnp.zeros((b, cout, h, w // 2 + 1), jnp.complex64)
    out_ft = out_ft.at[:, :, :modes1, :modes2].set(
        jnp.einsum('bixy,ioxy->boxy', x_ft[:, :, :modes1, :modes2], weights1))
    out_ft = out_ft.at[:, :, -modes1:, :modes2].set(
        jnp.einsum('bixy,ioxy->boxy', x_ft[:, :, -modes1:, :modes2], weights2))
    return jnp.fft.irfft2(out_ft, s=(h, w))


# --------------------------------------------------------------------------- #
if __name__ == "__main__":
    B, CIN, COUT = 2, 4, 6
    H, W = 16, 16
    MODES1, MODES2 = 4, 4

    key = jax.random.PRNGKey(0)
    k1, k2, k3, k4, k5 = jax.random.split(key, 5)
    scale = 1.0 / (CIN * COUT)
    w1 = (scale * jax.random.uniform(k1, (CIN, COUT, MODES1, MODES2), jnp.float32)
          + 1j * scale * jax.random.uniform(k2, (CIN, COUT, MODES1, MODES2), jnp.float32)
          ).astype(jnp.complex64)
    w2 = (scale * jax.random.uniform(k3, (CIN, COUT, MODES1, MODES2), jnp.float32)
          + 1j * scale * jax.random.uniform(k4, (CIN, COUT, MODES1, MODES2), jnp.float32)
          ).astype(jnp.complex64)
    x = jax.random.normal(k5, (B, CIN, H, W), jnp.float32)

    fm3, g = build_spectral_operators(np.asarray(w1), np.asarray(w2), H, W)

    run_kernel = jax.jit(spectral_conv2d_pallas)
    y = jax.block_until_ready(run_kernel(x, fm3, g))
    assert y.shape == (B, COUT, H, W), y.shape

    run_reference = jax.jit(
        lambda xx, ww1, ww2: spectral_conv2d_reference(xx, ww1, ww2, MODES1, MODES2))
    y_ref = jax.block_until_ready(run_reference(x, w1, w2))

    # bf16 MXU operands with f32 accumulation: expect ~1e-3-level absolute
    # agreement on the O(0.02 .. 0.1) outputs of this layer.
    np.testing.assert_allclose(np.asarray(y), np.asarray(y_ref),
                               rtol=2e-2, atol=2e-3)
    print("KERNEL_OK")
</pallas_src>

<mosaic_0001>
module attributes {stable_mosaic.version = 11 : i64} {
  func.func @_spectral_conv2d_kernel(%arg0: i32, %arg1: i32, %arg2: memref<8x1024xbf16, #tpu.memory_space<vmem>>, %arg3: memref<1x1024x64xbf16, #tpu.memory_space<vmem>>, %arg4: memref<64x256xbf16, #tpu.memory_space<vmem>>, %arg5: memref<8x256xf32, #tpu.memory_space<vmem>>) attributes {dimension_semantics = [#tpu.dimension_semantics<parallel>, #tpu.dimension_semantics<parallel>], iteration_bounds = array<i64: 1, 6>, scalar_prefetch = 0 : i64, scratch_operands = 0 : i64, tpu.core_type = #tpu.core_type<tc>, window_params = [{transform_indices = @transform_0, window_bounds = array<i64: 8, 1024>}, {transform_indices = @transform_1, window_bounds = array<i64: 1, 1024, 64>}, {pipeline_mode = #tpu.pipeline_mode<synchronous>, transform_indices = @transform_2, window_bounds = array<i64: 64, 256>}, {transform_indices = @transform_3, window_bounds = array<i64: 8, 256>}]} {
    %c0 = arith.constant 0 : index
    %c0_0 = arith.constant 0 : index
    %0 = vector.load %arg2[%c0, %c0_0] : memref<8x1024xbf16, #tpu.memory_space<vmem>>, vector<8x1024xbf16>
    %c0_1 = arith.constant 0 : index
    %c0_2 = arith.constant 0 : index
    %c0_3 = arith.constant 0 : index
    %1 = vector.load %arg3[%c0_1, %c0_2, %c0_3] : memref<1x1024x64xbf16, #tpu.memory_space<vmem>>, vector<1x1024x64xbf16>
    %2 = vector.shape_cast %1 : vector<1x1024x64xbf16> to vector<1024x64xbf16>
    %cst = arith.constant dense<0.000000e+00> : vector<8x64xf32>
    %3 = tpu.matmul %0, %2, %cst {dimension_numbers = #tpu.dot_dimension_numbers<[1], [0], [0], [1], [0, 0, 1, 1], [], []>} : vector<8x1024xbf16>, vector<1024x64xbf16>, vector<8x64xf32> -> vector<8x64xf32>
    %4 = arith.truncf %3 : vector<8x64xf32> to vector<8x64xbf16>
    %c0_4 = arith.constant 0 : index
    %c0_5 = arith.constant 0 : index
    %5 = vector.load %arg4[%c0_4, %c0_5] : memref<64x256xbf16, #tpu.memory_space<vmem>>, vector<64x256xbf16>
    %cst_6 = arith.constant dense<0.000000e+00> : vector<8x256xf32>
    %6 = tpu.matmul %4, %5, %cst_6 {dimension_numbers = #tpu.dot_dimension_numbers<[1], [0], [0], [1], [0, 0, 1, 1], [], []>} : vector<8x64xbf16>, vector<64x256xbf16>, vector<8x256xf32> -> vector<8x256xf32>
    %c0_7 = arith.constant 0 : index
    %c0_8 = arith.constant 0 : index
    %7 = vector.load %arg5[%c0_7, %c0_8] : memref<8x256xf32, #tpu.memory_space<vmem>>, vector<8x256xf32>
    tpu.vector_store %arg5[%c0_7, %c0_8], %6 {strides = array<i32>} : memref<8x256xf32, #tpu.memory_space<vmem>>, vector<8x256xf32>,
    return
  }
  func.func @transform_0(%arg0: i32, %arg1: i32) -> (i32, i32) {
    %c0_i32 = arith.constant 0 : i32
    %c0_i32_0 = arith.constant 0 : i32
    return %arg0, %c0_i32 : i32, i32
  }
  func.func @transform_1(%arg0: i32, %arg1: i32) -> (i32, i32, i32) {
    %c0_i32 = arith.constant 0 : i32
    %c0_i32_0 = arith.constant 0 : i32
    %c0_i32_1 = arith.constant 0 : i32
    return %arg1, %c0_i32, %c0_i32_0 : i32, i32, i32
  }
  func.func @transform_2(%arg0: i32, %arg1: i32) -> (i32, i32) {
    %c0_i32 = arith.constant 0 : i32
    %c0_i32_0 = arith.constant 0 : i32
    %c0_i32_1 = arith.constant 0 : i32
    return %c0_i32, %c0_i32_0 : i32, i32
  }
  func.func @transform_3(%arg0: i32, %arg1: i32) -> (i32, i32) {
    %c0_i32 = arith.constant 0 : i32
    return %arg0, %arg1 : i32, i32
  }
}

</mosaic_0001>

<bundles_post_ra>
// kernel: spectral_conv2d_pallas.1
= control target key start
LH: loop header
LB: loop body
LE: loop exit
PB: predicated region body
PF: predicated region fallthrough
CT: control target
= control target key end

     0   :  { %s1447_s12 = smov 0   ;;  %s1449_s13 = smov 0   ;;  %s1611_s0 = inlined_call_operand.vmem [shape: bf16[8,1024], index: 0, kind: input, shape index: {}]   ;;  %s1612_s1 = inlined_call_operand.vmem [shape: bf16[6,1024,64], index: 1, kind: input, shape index: {}]   ;;  %s1613_s2 = inlined_call_operand.vmem [shape: bf16[64,256], index: 2, kind: input, shape index: {}]   ;;  %s1614_s3 = inlined_call_operand.vmem [shape: f32[8,1536], index: 3, kind: output, shape index: {}]  }
   0x1   :  { %s1451_s14 = smov 0  }
   0x2 LB: > { %s22_s15 = sadd.s32 1, %s1420_s13  ;;  %p1116_p0 = scmp.ge.s32.totalorder %s1424_s14, 1  ;;  %s1424_s14 = sphi %s1451_s14, %s13_s14   ;;  %s1420_s13 = sphi %s1449_s13, %s1616_s13   ;;  %s1416_s12 = sphi %s1447_s12, %s1615_s12  }
   0x3   : > { %p23_p1 = scmp.ge.s32.totalorder %s22_s15, 6  ;;  %p161_p2 = scmp.lt.s32.totalorder %s1424_s14, 7 }
   0x5   : > { %s1618_s15 = smov (%p23_p1, %s22_s15), 0  ;;  %p162_p3 = pnand %p1116_p0, %p161_p2 }
   0x6   : > { %p199_p4 = scmp.lt.s32.totalorder (!%p162_p3), %s1416_s12, 5  ;;  %v1471_v0 = vld [vmem:[%s1611_s0] sm:$0xff] (!%p162_p3)  ;;  %v1476_v1 = vld [vmem:[%s1611_s0 + $0x8] sm:$0xff] (!%p162_p3)  ;;  %v1520_v33 = vld [vmem:[%s1611_s0 + $0x10] sm:$0xff] (!%p162_p3)  ;;  %vm968_vm0 = vcmask (!%p162_p3), 523264   ;;  %s1119_s22 = sshll.u32 (!%p162_p3), %s1416_s12, 1 }
   0x7   : > { %165 = sbr.rel (%p162_p3) target bundleno = 520 (0x208), region = 32  ;;  %v1122_v2 = vcombine.high (!%p162_p3), %v1471_v0, %v1471_v0  ;;  %v1124_v3 = vcombine.high (!%p162_p3), %v1476_v1, %v1476_v1  ;;  %v1526_v35 = vld [vmem:[%s1611_s0 + $0x18] sm:$0xff] (!%p162_p3)  ;;  %v1121_v38 = vcombine.low (!%p162_p3), %v1471_v0, %v1471_v0  ;;  %v1123_v39 = vcombine.low (!%p162_p3), %v1476_v1, %v1476_v1  ;;  %p207_p5 = scmp.lt.s32.totalorder (!%p162_p3), %s1119_s22, 11 }
   0x8   : > { %v1126_v42 = vcombine.high (!%p162_p3), %v1520_v33, %v1520_v33  ;;  %v1128_v44 = vcombine.high (!%p162_p3), %v1526_v35, %v1526_v35 }
   0x9   : > { %791 = vmatprep.mubr.bf16.mxu0 (!%p162_p3), %v1122_v2  ;;  %831 = vmatprep.mubr.bf16.mxu1 (!%p162_p3), %v1124_v3 }
   0xe   : > { %s200_s20 = scalar_select %p199_p4, %s1416_s12, 5 }
   0xf   : > { %s1620_s22 = smov (!%p207_p5, %s1119_s22), 11 }
  0x10   : > { %s1204_s21 = sshll.u32 %s200_s20, 9  ;;  %s1120_s23 = sshll.u32 %s1620_s22, 3 }
  0x11   : > { %s1486_s24 = scalar_lea.vmem %s1612_s1, %s1204_s21  ;;  %s212_s26 = scalar_lea.vmem %s1614_s3, %s1120_s23 }
  0x12   : > { %v1318_v4 = vld [vmem:[%s1486_s24 + $0x40] sm:$0xff]   ;;  %v1322_v8 = vld [vmem:[%s1486_s24 + $0x48] sm:$0xff]   ;;  %v1326_v12 = vld [vmem:[%s1486_s24 + $0x50] sm:$0xff]  }
  0x13   : > { %v1319_v5 = vld [vmem:[%s1486_s24 + $0xc0] sm:$0xff]   ;;  %1205 = vmatprep.subr.bf16.mxu0 %v1318_v4  ;;  %v1323_v9 = vld [vmem:[%s1486_s24 + $0xc8] sm:$0xff]   ;;  %v1327_v13 = vld [vmem:[%s1486_s24 + $0xd0] sm:$0xff]  }
  0x14   : > { %v1320_v6 = vld [vmem:[%s1486_s24] sm:$0xff]   ;;  %1227 = vmatprep.subr.bf16.mxu1 %v1319_v5  ;;  %v1324_v10 = vld [vmem:[%s1486_s24 + $0x8] sm:$0xff]   ;;  %v1328_v14 = vld [vmem:[%s1486_s24 + $0x10] sm:$0xff]  }
  0x15   : > { %v1321_v7 = vld [vmem:[%s1486_s24 + $0x80] sm:$0xff]   ;;  %1206 = vmatpush3.bf16.msra.mxu0 %v1320_v6  ;;  %v1325_v11 = vld [vmem:[%s1486_s24 + $0x88] sm:$0xff]   ;;  %v1329_v15 = vld [vmem:[%s1486_s24 + $0x90] sm:$0xff]  }
  0x16   : > { %1228 = vmatpush3.bf16.msra.mxu1 %v1321_v7  ;;  %1207 = vmatprep.subr.bf16.mxu0 %v1322_v8  ;;  %v1330_v16 = vld [vmem:[%s1486_s24 + $0x58] sm:$0xff]   ;;  %v1334_v20 = vld [vmem:[%s1486_s24 + $0x60] sm:$0xff]   ;;  %v1338_v24 = vld [vmem:[%s1486_s24 + $0x68] sm:$0xff]  }
  0x17   : > { %1229 = vmatprep.subr.bf16.mxu1 %v1323_v9  ;;  %v1331_v17 = vld [vmem:[%s1486_s24 + $0xd8] sm:$0xff]   ;;  %v1335_v21 = vld [vmem:[%s1486_s24 + $0xe0] sm:$0xff]   ;;  %v1339_v25 = vld [vmem:[%s1486_s24 + $0xe8] sm:$0xff]  }
  0x18   : > { %v1332_v18 = vld [vmem:[%s1486_s24 + $0x18] sm:$0xff]   ;;  %v1336_v22 = vld [vmem:[%s1486_s24 + $0x20] sm:$0xff]   ;;  %v1340_v26 = vld [vmem:[%s1486_s24 + $0x28] sm:$0xff]  }
  0x19   : > { %1208 = vmatpush3.bf16.msra.mxu0 %v1324_v10  ;;  %v1333_v19 = vld [vmem:[%s1486_s24 + $0x98] sm:$0xff]   ;;  %v1337_v23 = vld [vmem:[%s1486_s24 + $0xa0] sm:$0xff]   ;;  %v1341_v27 = vld [vmem:[%s1486_s24 + $0xa8] sm:$0xff]   ;;  %v1125_v10 = vcombine.low %v1520_v33, %v1520_v33 }
  0x1a   : > { %1230 = vmatpush3.bf16.msra.mxu1 %v1325_v11  ;;  %1209 = vmatprep.subr.bf16.mxu0 %v1326_v12  ;;  %v1342_v28 = vld [vmem:[%s1486_s24 + $0x70] sm:$0xff]   ;;  %v1346_v32 = vld [vmem:[%s1486_s24 + $0x78] sm:$0xff]   ;;  %v1354_v40 = vld [vmem:[%s1486_s24 + $0x140] sm:$0xff]   ;;  %v1127_v11 = vcombine.low %v1526_v35, %v1526_v35 }
  0x1b   : > { %1231 = vmatprep.subr.bf16.mxu1 %v1327_v13  ;;  %v1343_v29 = vld [vmem:[%s1486_s24 + $0xf0] sm:$0xff]   ;;  %v1347_v34 = vld [vmem:[%s1486_s24 + $0xf8] sm:$0xff]   ;;  %v1355_v41 = vld [vmem:[%s1486_s24 + $0x1c0] sm:$0xff]  }
  0x1c   : > { %v1344_v30 = vld [vmem:[%s1486_s24 + $0x30] sm:$0xff]   ;;  %v1348_v36 = vld [vmem:[%s1486_s24 + $0x38] sm:$0xff]   ;;  %v1356_v43 = vld [vmem:[%s1486_s24 + $0x100] sm:$0xff]  }
  0x1d   : > { %1210 = vmatpush3.bf16.msra.mxu0 %v1328_v14  ;;  %v1345_v31 = vld [vmem:[%s1486_s24 + $0xb0] sm:$0xff]   ;;  %v1349_v37 = vld [vmem:[%s1486_s24 + $0xb8] sm:$0xff]   ;;  %v1357_v45 = vld [vmem:[%s1486_s24 + $0x180] sm:$0xff]  }
  0x1e   : > { %1232 = vmatpush3.bf16.msra.mxu1 %v1329_v15  ;;  %1211 = vmatprep.subr.bf16.mxu0 %v1330_v16  ;;  %v1358_v46 = vld [vmem:[%s1486_s24 + $0x148] sm:$0xff]   ;;  %v1362_v50 = vld [vmem:[%s1486_s24 + $0x150] sm:$0xff]   ;;  %v1366_v54 = vld [vmem:[%s1486_s24 + $0x158] sm:$0xff]  }
  0x1f   : > { %1233 = vmatprep.subr.bf16.mxu1 %v1331_v17  ;;  %v1359_v47 = vld [vmem:[%s1486_s24 + $0x1c8] sm:$0xff]   ;;  %v1363_v51 = vld [vmem:[%s1486_s24 + $0x1d0] sm:$0xff]   ;;  %v1367_v55 = vld [vmem:[%s1486_s24 + $0x1d8] sm:$0xff]  }
  0x20   : > { %v1360_v48 = vld [vmem:[%s1486_s24 + $0x108] sm:$0xff]   ;;  %v1364_v52 = vld [vmem:[%s1486_s24 + $0x110] sm:$0xff]   ;;  %v1368_v56 = vld [vmem:[%s1486_s24 + $0x118] sm:$0xff]  }
  0x21   : > { %1212 = vmatpush3.bf16.msra.mxu0 %v1332_v18  ;;  %v1361_v49 = vld [vmem:[%s1486_s24 + $0x188] sm:$0xff]   ;;  %v1365_v53 = vld [vmem:[%s1486_s24 + $0x190] sm:$0xff]   ;;  %v1369_v57 = vld [vmem:[%s1486_s24 + $0x198] sm:$0xff]  }
  0x22   : > { %1234 = vmatpush3.bf16.msra.mxu1 %v1333_v19  ;;  %1213 = vmatprep.subr.bf16.mxu0 %v1334_v20  ;;  %v1370_v58 = vld [vmem:[%s1486_s24 + $0x160] sm:$0xff]   ;;  %v1374_v62 = vld [vmem:[%s1486_s24 + $0x168] sm:$0xff]   ;;  %v1378_v2 = vld [vmem:[%s1486_s24 + $0x170] sm:$0xff]   ;;  %v1426_v20 = vmov 0  }
  0x23   : > { %1235 = vmatprep.subr.bf16.mxu1 %v1335_v21  ;;  %v1371_v59 = vld [vmem:[%s1486_s24 + $0x1e0] sm:$0xff]   ;;  %v1375_v63 = vld [vmem:[%s1486_s24 + $0x1e8] sm:$0xff]   ;;  %v1379_v3 = vld [vmem:[%s1486_s24 + $0x1f0] sm:$0xff]  }
  0x24   : > { %v1372_v60 = vld [vmem:[%s1486_s24 + $0x120] sm:$0xff]   ;;  %v1376_v0 = vld [vmem:[%s1486_s24 + $0x128] sm:$0xff]   ;;  %v1380_v4 = vld [vmem:[%s1486_s24 + $0x130] sm:$0xff]  }
  0x25   : > { %1214 = vmatpush3.bf16.msra.mxu0 %v1336_v22  ;;  %v1373_v61 = vld [vmem:[%s1486_s24 + $0x1a0] sm:$0xff]   ;;  %v1377_v1 = vld [vmem:[%s1486_s24 + $0x1a8] sm:$0xff]   ;;  %v1381_v5 = vld [vmem:[%s1486_s24 + $0x1b0] sm:$0xff]  }
  0x26   : > { %1236 = vmatpush3.bf16.msra.mxu1 %v1337_v23  ;;  %1215 = vmatprep.subr.bf16.mxu0 %v1338_v24  ;;  %v1382_v6 = vld [vmem:[%s1486_s24 + $0x178] sm:$0xff]   ;;  %v1390_v12 = vld [vmem:[%s1613_s2] ss:$8 sps:$4 sm:$0xff]   ;;  %v1392_v13 = vld [vmem:[%s1613_s2 + $0x4] ss:$8 sps:$4 sm:$0xff]  }
  0x27   : > { %1237 = vmatprep.subr.bf16.mxu1 %v1339_v25  ;;  %v1383_v7 = vld [vmem:[%s1486_s24 + $0x1f8] sm:$0xff]   ;;  %v1398_v16 = vld [vmem:[%s1613_s2 + $0x24] ss:$8 sps:$4 sm:$0xff]   ;;  %v1396_v17 = vld [vmem:[%s1613_s2 + $0x20] ss:$8 sps:$4 sm:$0xff]  }
  0x28   : > { %v1384_v8 = vld [vmem:[%s1486_s24 + $0x138] sm:$0xff]  }
  0x29   : > { %1216 = vmatpush3.bf16.msra.mxu0 %v1340_v26  ;;  %v1385_v9 = vld [vmem:[%s1486_s24 + $0x1b8] sm:$0xff]  }
  0x2a   : > { %1238 = vmatpush3.bf16.msra.mxu1 %v1341_v27  ;;  %1217 = vmatprep.subr.bf16.mxu0 %v1342_v28  ;;  %v1395_v14 = vld [vmem:[%s1613_s2 + $0x14] ss:$8 sps:$4 sm:$0xff]   ;;  %v1393_v15 = vld [vmem:[%s1613_s2 + $0x10] ss:$8 sps:$4 sm:$0xff]  }
  0x2b   : > { %1239 = vmatprep.subr.bf16.mxu1 %v1343_v29  ;;  %v1401_v18 = vld [vmem:[%s1613_s2 + $0x34] ss:$8 sps:$4 sm:$0xff]   ;;  %v1399_v19 = vld [vmem:[%s1613_s2 + $0x30] ss:$8 sps:$4 sm:$0xff]  }
  0x2d   : > { %1218 = vmatpush3.bf16.msra.mxu0 %v1344_v30 }
  0x2e   : > { %1240 = vmatpush3.bf16.msra.mxu1 %v1345_v31  ;;  %1219 = vmatprep.subr.bf16.mxu0 %v1346_v32 }
  0x2f   : > { %1241 = vmatprep.subr.bf16.mxu1 %v1347_v34 }
  0x31   : > { %1220 = vmatpush3.bf16.msra.mxu0 %v1348_v36 }
  0x32   : > { %1242 = vmatpush3.bf16.msra.mxu1 %v1349_v37  ;;  %1249 = vmatprep.subr.bf16.mxu0 %v1354_v40 }
  0x33   : > { %1271 = vmatprep.subr.bf16.mxu1 %v1355_v41 }
  0x34   : > { %792 = vmatmul.mubr.bf16.vlgmr.msra.gmra.mrb[0].mxu0 %v1121_v38 }
  0x35   : > { %832 = vmatmul.mubr.bf16.vlgmr.msra.gmra.mrb[0].mxu1 %v1123_v39  ;;  %1250 = vmatpush3.bf16.msra.mxu0 %v1356_v43 }
  0x36   : > { %1272 = vmatpush3.bf16.msra.mxu1 %v1357_v45  ;;  %871 = vmatprep.mubr.bf16.mxu0 %v1126_v42 }
  0x37   : > { %1251 = vmatprep.subr.bf16.mxu0 %v1358_v46  ;;  %911 = vmatprep.mubr.bf16.mxu1 %v1128_v44 }
  0x38   : > { %1273 = vmatprep.subr.bf16.mxu1 %v1359_v47 }
  0x39   : > { %1252 = vmatpush3.bf16.msra.mxu0 %v1360_v48 }
  0x3a   : > { %1274 = vmatpush3.bf16.msra.mxu1 %v1361_v49  ;;  %1253 = vmatprep.subr.bf16.mxu0 %v1362_v50 }
  0x3b   : > { %1275 = vmatprep.subr.bf16.mxu1 %v1363_v51 }
  0x3d   : > { %1254 = vmatpush3.bf16.msra.mxu0 %v1364_v52 }
  0x3e   : > { %1276 = vmatpush3.bf16.msra.mxu1 %v1365_v53  ;;  %1255 = vmatprep.subr.bf16.mxu0 %v1366_v54 }
  0x3f   : > { %1277 = vmatprep.subr.bf16.mxu1 %v1367_v55 }
  0x41   : > { %1256 = vmatpush3.bf16.msra.mxu0 %v1368_v56 }
  0x42   : > { %1278 = vmatpush3.bf16.msra.mxu1 %v1369_v57  ;;  %1257 = vmatprep.subr.bf16.mxu0 %v1370_v58 }
  0x43   : > { %1279 = vmatprep.subr.bf16.mxu1 %v1371_v59 }
  0x45   : > { %1258 = vmatpush3.bf16.msra.mxu0 %v1372_v60 }
  0x46   : > { %1280 = vmatpush3.bf16.msra.mxu1 %v1373_v61  ;;  %1259 = vmatprep.subr.bf16.mxu0 %v1374_v62 }
  0x47   : > { %1281 = vmatprep.subr.bf16.mxu1 %v1375_v63 }
  0x49   : > { %1260 = vmatpush3.bf16.msra.mxu0 %v1376_v0 }
  0x4a   : > { %1282 = vmatpush3.bf16.msra.mxu1 %v1377_v1  ;;  %1261 = vmatprep.subr.bf16.mxu0 %v1378_v2 }
  0x4b   : > { %1283 = vmatprep.subr.bf16.mxu1 %v1379_v3 }
  0x4d   : > { %1262 = vmatpush3.bf16.msra.mxu0 %v1380_v4 }
  0x4e   : > { %1284 = vmatpush3.bf16.msra.mxu1 %v1381_v5  ;;  %1263 = vmatprep.subr.bf16.mxu0 %v1382_v6 }
  0x4f   : > { %1285 = vmatprep.subr.bf16.mxu1 %v1383_v7 }
  0x51   : > { %1264 = vmatpush3.bf16.msra.mxu0 %v1384_v8 }
  0x52   : > { %1286 = vmatpush3.bf16.msra.mxu1 %v1385_v9  ;;  %972 = vmatprep.subr.bf16.mxu0 %v1392_v13 }
  0x54   : > { %872 = vmatmul.mubr.bf16.vlgmr.msra.gmra.mrb[4].mxu0 %v1125_v10 }
  0x55   : > { %912 = vmatmul.mubr.bf16.vlgmr.msra.gmra.mrb[4].mxu1 %v1127_v11  ;;  %973 = vmatpush1.bf16.msra.mxu0 %v1390_v12 }
  0x56   : > { %974 = vmatprep.subr.bf16.mxu0 %v1395_v14  ;;  %1004 = vmatprep.mubr.bf16.mxu0 %v1426_v20 }
  0x59   : > { %975 = vmatpush1.bf16.msra.mxu0 %v1393_v15 }
  0x5a   : > { %976 = vmatprep.subr.bf16.mxu0 %v1398_v16 }
  0x5d   : > { %977 = vmatpush1.bf16.msra.mxu0 %v1396_v17 }
  0x5e   : > { %978 = vmatprep.subr.bf16.mxu0 %v1401_v18 }
  0x61   : > { %979 = vmatpush1.bf16.msra.mxu0 %v1399_v19 }
 0x107   : > { %v1221_v21 = vpop.f32.mrb[0].mxu0 }
 0x108   : > { %v1243_v22 = vpop.f32.mrb[0].mxu1  ;;  %v1222_v23 = vpop.f32.mrb[1].mxu0 }
 0x109   : > { %v1223_v24 = vadd.f32 %v1222_v23, %v1221_v21  ;;  %v1244_v25 = vpop.f32.mrb[1].mxu1  ;;  %v1224_v26 = vpop.f32.mrb[2].mxu0 }
 0x10a   : > { %v1245_v27 = vadd.f32 %v1244_v25, %v1243_v22  ;;  %v1246_v28 = vpop.f32.mrb[2].mxu1  ;;  %v1225_v29 = vpop.f32.mrb[3].mxu0 }
 0x10b   : > { %v1247_v30 = vpop.f32.mrb[3].mxu1 }
 0x10c   : > { %v834_v31 = vadd.f32 %v1245_v27, %v1223_v24 }
 0x127   : > { %v1265_v32 = vpop.f32.mrb[4].mxu0 }
 0x128   : > { %v1287_v33 = vpop.f32.mrb[4].mxu1  ;;  %v1266_v34 = vpop.f32.mrb[5].mxu0 }
 0x129   : > { %v1267_v35 = vadd.f32 %v1266_v34, %v1265_v32  ;;  %v1288_v36 = vpop.f32.mrb[5].mxu1  ;;  %v1268_v37 = vpop.f32.mrb[6].mxu0 }
 0x12a   : > { %v1289_v38 = vadd.f32 %v1288_v36, %v1287_v33  ;;  %v1290_v39 = vpop.f32.mrb[6].mxu1  ;;  %v1269_v40 = vpop.f32.mrb[7].mxu0 }
 0x12b   : > { %v874_v41 = vadd.f32 %v1267_v35, %v834_v31  ;;  %v1291_v42 = vpop.f32.mrb[7].mxu1 }
 0x12d   : > { %v914_v43 = vadd.f32 %v1289_v38, %v874_v41 }
 0x12f   : > { %v919_v44 = vpack.c.bf16 %v914_v43, %v914_v43 }
 0x131   : > { %1201 = vmatmul.mubr.msk.bf16.vlgmr.msra.gmra.mrb[8].mxu0 %vm968_vm0, %v919_v44 }
 0x204   : > { %v1006_v45 = vpop.f32.mrb[8].mxu0 }
 0x205   : > { %1013 = vst [vmem:[%s212_s26] sm:$0xff] %v1006_v45  ;;  %v1008_v46 = vpop.f32.mrb[9].mxu0 }
 0x206   : > { %1014 = vst [vmem:[%s212_s26 + $0x8] sm:$0xff] %v1008_v46  ;;  %v1010_v47 = vpop.f32.mrb[10].mxu0 }
 0x207   : > { %v1011_v48 = vpop.f32.mrb[11].mxu0 }
 0x208 PF: > { %s13_s14 = sadd.s32 1, %s1424_s14   ;;  %s1615_s12 = smov %s1420_s13 }
 0x209   : > { %p10_p6 = scmp.ge.s32.totalorder %s13_s14, 8   ;;  %s1616_s13 = smov %s1618_s15 }
 0x20b   :  { %12 = sbr.rel (!%p10_p6) target bundleno = 2 (0x2), region = 65 }

</bundles_post_ra>
